<compile_context>
chip_gen: v5e
topology: v5e:2x2
jax: 0.10.0
libtpu: 0.0.40
codegen_flags: <defaults>
</compile_context>

<pallas_src>
import functools

import numpy as np
import jax
import jax.numpy as jnp
from jax import lax
from jax.experimental import pallas as pl
from jax.experimental.pallas import tpu as pltpu

# ---------------- synthetic "parameters._parameters" config ----------------
BATCH = 2
DIM = 16                      # H == W == DIM (source grid must match field grid)
FREQUENCY = 2.0
VACUUM_PERMEABILITY = 4.0 * np.pi * 1e-7
KERNEL_SIZE = 5
MAX_ORDER = 2
DX = 0.1
DT = 0.01
# max_num_kernel_each_order = MAX_ORDER + 1; derivative_num per the module:
DERIVATIVE_NUM = int(np.sum(np.arange(MAX_ORDER + 1) + 1) - 1)   # = 5 for MAX_ORDER=2


# ------------------------------ j_gen (glue) --------------------------------
def j_source_diffs(stepnum, freq, dim, dt):
    """real(jj2) - real(jj0) for each step, mirroring j_gen(). Returns (S,H,W)."""
    source_mode = 2.0 * np.pi * freq * (-1.0 + 1.0j)
    jj0 = np.zeros((dim, dim), dtype=complex)
    jj0[dim // 2, dim // 2] = 1.0
    jj1 = jj0 + dt * source_mode * jj0
    jj2 = jj1 + dt * source_mode * jj1
    outs = []
    for _ in range(stepnum):
        outs.append(np.real(jj2) - np.real(jj0))
        jj0 = jj0 + dt * source_mode * jj0
        jj2 = jj2 + dt * source_mode * jj2
    return jnp.asarray(np.stack(outs), jnp.float32)


# ------------------------------ Pallas kernel -------------------------------
def _fused_kernel(u1p0_ref, u00_ref, ccombo_ref, cj_ref, cu1_ref, cu0_ref,
                  jd_ref, w_ref, out_ref, u1p_buf, u0_buf, *, K, H, W, pad):
    """All time steps for one batch element; state lives in VMEM scratch.

    u1p0_ref : (1, Hp, Wp) zero-padded initial u1 (Dirichlet halo)
    u00_ref  : (1, H, W)   initial u0 interior
    c*_ref   : (1, H, W)   precomputed time-invariant coefficient maps
    jd_ref   : (1, H, W)   per-step source difference real(jj2)-real(jj0)
    w_ref    : SMEM (K*K,) effective (combofd-folded) stencil weights
    u1p_buf  : VMEM (Hp, Wp) padded current field (halo stays zero)
    u0_buf   : VMEM (H, W)   previous field interior
    """
    s = pl.program_id(1)

    @pl.when(s == 0)
    def _init():
        u1p_buf[...] = u1p0_ref[0]
        u0_buf[...] = u00_ref[0]

    u1p = u1p_buf[...]                            # (Hp, Wp)

    # Folded FD bank + 1x1 combofd: single K*K shifted-window pass.
    combo = jnp.zeros((H, W), jnp.float32)
    for ky in range(K):
        for kx in range(K):
            combo = combo + w_ref[ky * K + kx] * u1p[ky:ky + H, kx:kx + W]

    u1i = u1p[pad:pad + H, pad:pad + W]           # id_u1(u1) == u1
    u0i = u0_buf[...]                             # id_u0(u0) == u0
    jd = jd_ref[0]

    # u2 = (2dt/mu*combo - jd + 2a*u1 - (a-sigma)*u0) / (a+sigma), a = 2*epsr/dt
    u2 = (ccombo_ref[0] * combo - cj_ref[0] * jd
          + cu1_ref[0] * u1i - cu0_ref[0] * u0i)

    # Roll the state: u0 <- u1, u1 <- u2 (halo of u1p_buf stays zero).
    u0_buf[...] = u1i
    u1p_buf[pad:pad + H, pad:pad + W] = u2

    @pl.when(s == pl.num_programs(1) - 1)
    def _finalize():
        out_ref[0] = u2


@functools.partial(jax.jit, static_argnums=(1, 4, 5))
def single_nonlinear2d_forward(init, stepnum, fd_w, combo_w, dt, mu):
    """Mirrors SingleNonLinear2d.forward.  init = (u1, u0, epsr, sigma) NCHW."""
    u1, u0, epsr, sigma = init
    assert u1.ndim == 4
    B, C, H, W = u1.shape
    assert C == 1
    D, K, _ = fd_w.shape
    pad = K // 2
    Hp, Wp = H + 2 * pad, W + 2 * pad
    dt = float(dt)
    mu = float(mu)

    jdiffs = j_source_diffs(stepnum, FREQUENCY, DIM, dt)          # (S, H, W)

    u1s, u0s = u1[:, 0], u0[:, 0]
    es, ss = epsr[:, 0], sigma[:, 0]
    u1p0 = jnp.pad(u1s, ((0, 0), (pad, pad), (pad, pad)))         # Dirichlet

    # Time-invariant coefficient maps (computed once, not per step).
    a = 2.0 * es / dt
    inv = 1.0 / (a + ss)
    c_combo = (2.0 * dt / mu) * inv
    c_j = inv
    c_u1 = 2.0 * a * inv
    c_u0 = (a - ss) * inv

    # Fold the 1x1 combofd reduction into the FD bank -> one KxK kernel.
    w_eff = jnp.einsum("d,dkl->kl", combo_w, fd_w).reshape(-1)    # (K*K,)

    kernel = functools.partial(_fused_kernel, K=K, H=H, W=W, pad=pad)
    bmap = lambda b, s: (b, 0, 0)
    out = pl.pallas_call(
        kernel,
        out_shape=jax.ShapeDtypeStruct((B, H, W), jnp.float32),
        grid=(B, stepnum),
        in_specs=[
            pl.BlockSpec((1, Hp, Wp), bmap),                      # padded init u1
            pl.BlockSpec((1, H, W), bmap),                        # init u0
            pl.BlockSpec((1, H, W), bmap),                        # c_combo
            pl.BlockSpec((1, H, W), bmap),                        # c_j
            pl.BlockSpec((1, H, W), bmap),                        # c_u1
            pl.BlockSpec((1, H, W), bmap),                        # c_u0
            pl.BlockSpec((1, H, W), lambda b, s: (s, 0, 0)),      # per-step source
            pl.BlockSpec(memory_space=pltpu.SMEM),                # folded weights
        ],
        out_specs=pl.BlockSpec((1, H, W), bmap),
        scratch_shapes=[
            pltpu.VMEM((Hp, Wp), jnp.float32),                    # padded u1 state
            pltpu.VMEM((H, W), jnp.float32),                      # u0 state
        ],
        compiler_params=pltpu.CompilerParams(
            dimension_semantics=("parallel", "arbitrary")),
    )(u1p0, u0s, c_combo, c_j, c_u1, c_u0, jdiffs, w_eff)
    return out[:, None]                                           # back to NCHW


# --------------------------- pure-JAX reference -----------------------------
def _ref_forward(init, stepnum, fd_w, combo_w, dt, mu):
    u1, u0, epsr, sigma = init
    jdiffs = j_source_diffs(stepnum, FREQUENCY, DIM, dt)
    u2 = None
    for i in range(stepnum):
        if i > 0:
            u0, u1 = u1, u2
        u1fd = lax.conv_general_dilated(
            u1, fd_w[:, None], (1, 1), "SAME",
            dimension_numbers=("NCHW", "OIHW", "NCHW"))
        combo = jnp.sum(combo_w[None, :, None, None] * u1fd, axis=1, keepdims=True)
        a = 2.0 * epsr / dt
        rhs = ((2.0 * dt / mu) * combo - jdiffs[i][None, None]
               + 2.0 * a * u1 - (a - sigma) * u0)
        u2 = rhs / (a + sigma)
    return u2


# ---------------------------------- main -------------------------------------
if __name__ == "__main__":
    key = jax.random.PRNGKey(0)
    k1, k2, k3, k4, k5, k6 = jax.random.split(key, 6)

    B, H, W = BATCH, DIM, DIM
    u1 = jax.random.normal(k1, (B, 1, H, W), jnp.float32)
    u0 = jax.random.normal(k2, (B, 1, H, W), jnp.float32)
    epsr = 1.0 + jax.random.uniform(k3, (B, 1, H, W), jnp.float32)
    sigma = 0.1 * jax.random.uniform(k4, (B, 1, H, W), jnp.float32)

    # TODO(synk): FD2d.MomentBank kernels are moment-constrained in the original
    # code; here the derivative bank (channels 1: of fd2d_u1) is synthesized
    # deterministically with the correct shape (derivative_num, K, K).
    fd_w = 0.1 * jax.random.normal(k5, (DERIVATIVE_NUM, KERNEL_SIZE, KERNEL_SIZE),
                                   jnp.float32)
    # combofd.weight is zero-initialized in __init__, but we test with nonzero
    # weights so the FD-bank/stencil path is actually exercised by the check.
    combo_w = 0.02 * jax.random.normal(k6, (DERIVATIVE_NUM,), jnp.float32)

    init = (u1, u0, epsr, sigma)
    stepnum = 3
    out = single_nonlinear2d_forward(init, stepnum, fd_w, combo_w,
                                     DT, VACUUM_PERMEABILITY)
    out = jax.block_until_ready(out)

    ref = _ref_forward(init, stepnum, fd_w, combo_w, DT, VACUUM_PERMEABILITY)
    assert out.shape == (B, 1, H, W)
    assert bool(jnp.all(jnp.isfinite(out)))
    np.testing.assert_allclose(np.asarray(out), np.asarray(ref),
                               rtol=1e-4, atol=1e-3)
    print("KERNEL_OK")
</pallas_src>

<mosaic_0001>
module attributes {stable_mosaic.version = 11 : i64} {
  func.func @_fused_kernel(%arg0: i32, %arg1: i32, %arg2: memref<1x20x20xf32, #tpu.memory_space<vmem>>, %arg3: memref<1x16x16xf32, #tpu.memory_space<vmem>>, %arg4: memref<1x16x16xf32, #tpu.memory_space<vmem>>, %arg5: memref<1x16x16xf32, #tpu.memory_space<vmem>>, %arg6: memref<1x16x16xf32, #tpu.memory_space<vmem>>, %arg7: memref<1x16x16xf32, #tpu.memory_space<vmem>>, %arg8: memref<1x16x16xf32, #tpu.memory_space<vmem>>, %arg9: memref<25xf32, #tpu.memory_space<smem>>, %arg10: memref<1x16x16xf32, #tpu.memory_space<vmem>>, %arg11: memref<20x20xf32, #tpu.memory_space<vmem>>, %arg12: memref<16x16xf32, #tpu.memory_space<vmem>>) attributes {dimension_semantics = [#tpu.dimension_semantics<parallel>, #tpu.dimension_semantics<arbitrary>], iteration_bounds = array<i64: 2, 3>, scalar_prefetch = 0 : i64, scratch_operands = 2 : i64, tpu.core_type = #tpu.core_type<tc>, window_params = [{transform_indices = @transform_0, window_bounds = array<i64: 1, 20, 20>}, {transform_indices = @transform_1, window_bounds = array<i64: 1, 16, 16>}, {transform_indices = @transform_2, window_bounds = array<i64: 1, 16, 16>}, {transform_indices = @transform_3, window_bounds = array<i64: 1, 16, 16>}, {transform_indices = @transform_4, window_bounds = array<i64: 1, 16, 16>}, {transform_indices = @transform_5, window_bounds = array<i64: 1, 16, 16>}, {transform_indices = @transform_6, window_bounds = array<i64: 1, 16, 16>}, {transform_indices = @transform_7, window_bounds = array<i64: 25>}, {transform_indices = @transform_8, window_bounds = array<i64: 1, 16, 16>}]} {
    %c0_i32 = arith.constant 0 : i32
    %0 = arith.cmpi eq, %arg1, %c0_i32 : i32
    %1 = arith.extui %0 : i1 to i32
    %c0_i32_0 = arith.constant 0 : i32
    %2 = arith.cmpi ne, %1, %c0_i32_0 : i32
    scf.if %2 {
      %c0_25 = arith.constant 0 : index
      %c0_26 = arith.constant 0 : index
      %c0_27 = arith.constant 0 : index
      %154 = vector.load %arg2[%c0_25, %c0_26, %c0_27] : memref<1x20x20xf32, #tpu.memory_space<vmem>>, vector<1x20x20xf32>
      %155 = vector.shape_cast %154 : vector<1x20x20xf32> to vector<20x20xf32>
      %c0_28 = arith.constant 0 : index
      %c0_29 = arith.constant 0 : index
      %156 = vector.load %arg11[%c0_28, %c0_29] : memref<20x20xf32, #tpu.memory_space<vmem>>, vector<20x20xf32>
      tpu.vector_store %arg11[%c0_28, %c0_29], %155 {strides = array<i32>} : memref<20x20xf32, #tpu.memory_space<vmem>>, vector<20x20xf32>,
      %c0_30 = arith.constant 0 : index
      %c0_31 = arith.constant 0 : index
      %c0_32 = arith.constant 0 : index
      %157 = vector.load %arg3[%c0_30, %c0_31, %c0_32] : memref<1x16x16xf32, #tpu.memory_space<vmem>>, vector<1x16x16xf32>
      %158 = vector.shape_cast %157 : vector<1x16x16xf32> to vector<16x16xf32>
      %c0_33 = arith.constant 0 : index
      %c0_34 = arith.constant 0 : index
      %159 = vector.load %arg12[%c0_33, %c0_34] : memref<16x16xf32, #tpu.memory_space<vmem>>, vector<16x16xf32>
      tpu.vector_store %arg12[%c0_33, %c0_34], %158 {strides = array<i32>} : memref<16x16xf32, #tpu.memory_space<vmem>>, vector<16x16xf32>,
    } else {
    }
    %c0 = arith.constant 0 : index
    %c0_1 = arith.constant 0 : index
    %3 = vector.load %arg11[%c0, %c0_1] : memref<20x20xf32, #tpu.memory_space<vmem>>, vector<20x20xf32>
    %cst = arith.constant 0.000000e+00 : f32
    %4 = vector.broadcast %cst : f32 to vector<16x16xf32>
    %c0_2 = arith.constant 0 : index
    %5 = memref.load %arg9[%c0_2] : memref<25xf32, #tpu.memory_space<smem>>
    %6 = vector.extract_strided_slice %3 {offsets = [0, 0], sizes = [16, 16], strides = [1, 1]} : vector<20x20xf32> to vector<16x16xf32>
    %7 = vector.broadcast %5 : f32 to vector<16x16xf32>
    %8 = arith.mulf %7, %6 : vector<16x16xf32>
    %9 = arith.addf %4, %8 : vector<16x16xf32>
    %c1 = arith.constant 1 : index
    %10 = memref.load %arg9[%c1] : memref<25xf32, #tpu.memory_space<smem>>
    %11 = vector.extract_strided_slice %3 {offsets = [0, 1], sizes = [16, 16], strides = [1, 1]} : vector<20x20xf32> to vector<16x16xf32>
    %12 = vector.broadcast %10 : f32 to vector<16x16xf32>
    %13 = arith.mulf %12, %11 : vector<16x16xf32>
    %14 = arith.addf %9, %13 : vector<16x16xf32>
    %c2 = arith.constant 2 : index
    %15 = memref.load %arg9[%c2] : memref<25xf32, #tpu.memory_space<smem>>
    %16 = vector.extract_strided_slice %3 {offsets = [0, 2], sizes = [16, 16], strides = [1, 1]} : vector<20x20xf32> to vector<16x16xf32>
    %17 = vector.broadcast %15 : f32 to vector<16x16xf32>
    %18 = arith.mulf %17, %16 : vector<16x16xf32>
    %19 = arith.addf %14, %18 : vector<16x16xf32>
    %c3 = arith.constant 3 : index
    %20 = memref.load %arg9[%c3] : memref<25xf32, #tpu.memory_space<smem>>
    %21 = vector.extract_strided_slice %3 {offsets = [0, 3], sizes = [16, 16], strides = [1, 1]} : vector<20x20xf32> to vector<16x16xf32>
    %22 = vector.broadcast %20 : f32 to vector<16x16xf32>
    %23 = arith.mulf %22, %21 : vector<16x16xf32>
    %24 = arith.addf %19, %23 : vector<16x16xf32>
    %c4 = arith.constant 4 : index
    %25 = memref.load %arg9[%c4] : memref<25xf32, #tpu.memory_space<smem>>
    %26 = vector.extract_strided_slice %3 {offsets = [0, 4], sizes = [16, 16], strides = [1, 1]} : vector<20x20xf32> to vector<16x16xf32>
    %27 = vector.broadcast %25 : f32 to vector<16x16xf32>
    %28 = arith.mulf %27, %26 : vector<16x16xf32>
    %29 = arith.addf %24, %28 : vector<16x16xf32>
    %c5 = arith.constant 5 : index
    %30 = memref.load %arg9[%c5] : memref<25xf32, #tpu.memory_space<smem>>
    %31 = vector.extract_strided_slice %3 {offsets = [1, 0], sizes = [16, 16], strides = [1, 1]} : vector<20x20xf32> to vector<16x16xf32>
    %32 = vector.broadcast %30 : f32 to vector<16x16xf32>
    %33 = arith.mulf %32, %31 : vector<16x16xf32>
    %34 = arith.addf %29, %33 : vector<16x16xf32>
    %c6 = arith.constant 6 : index
    %35 = memref.load %arg9[%c6] : memref<25xf32, #tpu.memory_space<smem>>
    %36 = vector.extract_strided_slice %3 {offsets = [1, 1], sizes = [16, 16], strides = [1, 1]} : vector<20x20xf32> to vector<16x16xf32>
    %37 = vector.broadcast %35 : f32 to vector<16x16xf32>
    %38 = arith.mulf %37, %36 : vector<16x16xf32>
    %39 = arith.addf %34, %38 : vector<16x16xf32>
    %c7 = arith.constant 7 : index
    %40 = memref.load %arg9[%c7] : memref<25xf32, #tpu.memory_space<smem>>
    %41 = vector.extract_strided_slice %3 {offsets = [1, 2], sizes = [16, 16], strides = [1, 1]} : vector<20x20xf32> to vector<16x16xf32>
    %42 = vector.broadcast %40 : f32 to vector<16x16xf32>
    %43 = arith.mulf %42, %41 : vector<16x16xf32>
    %44 = arith.addf %39, %43 : vector<16x16xf32>
    %c8 = arith.constant 8 : index
    %45 = memref.load %arg9[%c8] : memref<25xf32, #tpu.memory_space<smem>>
    %46 = vector.extract_strided_slice %3 {offsets = [1, 3], sizes = [16, 16], strides = [1, 1]} : vector<20x20xf32> to vector<16x16xf32>
    %47 = vector.broadcast %45 : f32 to vector<16x16xf32>
    %48 = arith.mulf %47, %46 : vector<16x16xf32>
    %49 = arith.addf %44, %48 : vector<16x16xf32>
    %c9 = arith.constant 9 : index
    %50 = memref.load %arg9[%c9] : memref<25xf32, #tpu.memory_space<smem>>
    %51 = vector.extract_strided_slice %3 {offsets = [1, 4], sizes = [16, 16], strides = [1, 1]} : vector<20x20xf32> to vector<16x16xf32>
    %52 = vector.broadcast %50 : f32 to vector<16x16xf32>
    %53 = arith.mulf %52, %51 : vector<16x16xf32>
    %54 = arith.addf %49, %53 : vector<16x16xf32>
    %c10 = arith.constant 10 : index
    %55 = memref.load %arg9[%c10] : memref<25xf32, #tpu.memory_space<smem>>
    %56 = vector.extract_strided_slice %3 {offsets = [2, 0], sizes = [16, 16], strides = [1, 1]} : vector<20x20xf32> to vector<16x16xf32>
    %57 = vector.broadcast %55 : f32 to vector<16x16xf32>
    %58 = arith.mulf %57, %56 : vector<16x16xf32>
    %59 = arith.addf %54, %58 : vector<16x16xf32>
    %c11 = arith.constant 11 : index
    %60 = memref.load %arg9[%c11] : memref<25xf32, #tpu.memory_space<smem>>
    %61 = vector.extract_strided_slice %3 {offsets = [2, 1], sizes = [16, 16], strides = [1, 1]} : vector<20x20xf32> to vector<16x16xf32>
    %62 = vector.broadcast %60 : f32 to vector<16x16xf32>
    %63 = arith.mulf %62, %61 : vector<16x16xf32>
    %64 = arith.addf %59, %63 : vector<16x16xf32>
    %c12 = arith.constant 12 : index
    %65 = memref.load %arg9[%c12] : memref<25xf32, #tpu.memory_space<smem>>
    %66 = vector.extract_strided_slice %3 {offsets = [2, 2], sizes = [16, 16], strides = [1, 1]} : vector<20x20xf32> to vector<16x16xf32>
    %67 = vector.broadcast %65 : f32 to vector<16x16xf32>
    %68 = arith.mulf %67, %66 : vector<16x16xf32>
    %69 = arith.addf %64, %68 : vector<16x16xf32>
    %c13 = arith.constant 13 : index
    %70 = memref.load %arg9[%c13] : memref<25xf32, #tpu.memory_space<smem>>
    %71 = vector.extract_strided_slice %3 {offsets = [2, 3], sizes = [16, 16], strides = [1, 1]} : vector<20x20xf32> to vector<16x16xf32>
    %72 = vector.broadcast %70 : f32 to vector<16x16xf32>
    %73 = arith.mulf %72, %71 : vector<16x16xf32>
    %74 = arith.addf %69, %73 : vector<16x16xf32>
    %c14 = arith.constant 14 : index
    %75 = memref.load %arg9[%c14] : memref<25xf32, #tpu.memory_space<smem>>
    %76 = vector.extract_strided_slice %3 {offsets = [2, 4], sizes = [16, 16], strides = [1, 1]} : vector<20x20xf32> to vector<16x16xf32>
    %77 = vector.broadcast %75 : f32 to vector<16x16xf32>
    %78 = arith.mulf %77, %76 : vector<16x16xf32>
    %79 = arith.addf %74, %78 : vector<16x16xf32>
    %c15 = arith.constant 15 : index
    %80 = memref.load %arg9[%c15] : memref<25xf32, #tpu.memory_space<smem>>
    %81 = vector.extract_strided_slice %3 {offsets = [3, 0], sizes = [16, 16], strides = [1, 1]} : vector<20x20xf32> to vector<16x16xf32>
    %82 = vector.broadcast %80 : f32 to vector<16x16xf32>
    %83 = arith.mulf %82, %81 : vector<16x16xf32>
    %84 = arith.addf %79, %83 : vector<16x16xf32>
    %c16 = arith.constant 16 : index
    %85 = memref.load %arg9[%c16] : memref<25xf32, #tpu.memory_space<smem>>
    %86 = vector.extract_strided_slice %3 {offsets = [3, 1], sizes = [16, 16], strides = [1, 1]} : vector<20x20xf32> to vector<16x16xf32>
    %87 = vector.broadcast %85 : f32 to vector<16x16xf32>
    %88 = arith.mulf %87, %86 : vector<16x16xf32>
    %89 = arith.addf %84, %88 : vector<16x16xf32>
    %c17 = arith.constant 17 : index
    %90 = memref.load %arg9[%c17] : memref<25xf32, #tpu.memory_space<smem>>
    %91 = vector.extract_strided_slice %3 {offsets = [3, 2], sizes = [16, 16], strides = [1, 1]} : vector<20x20xf32> to vector<16x16xf32>
    %92 = vector.broadcast %90 : f32 to vector<16x16xf32>
    %93 = arith.mulf %92, %91 : vector<16x16xf32>
    %94 = arith.addf %89, %93 : vector<16x16xf32>
    %c18 = arith.constant 18 : index
    %95 = memref.load %arg9[%c18] : memref<25xf32, #tpu.memory_space<smem>>
    %96 = vector.extract_strided_slice %3 {offsets = [3, 3], sizes = [16, 16], strides = [1, 1]} : vector<20x20xf32> to vector<16x16xf32>
    %97 = vector.broadcast %95 : f32 to vector<16x16xf32>
    %98 = arith.mulf %97, %96 : vector<16x16xf32>
    %99 = arith.addf %94, %98 : vector<16x16xf32>
    %c19 = arith.constant 19 : index
    %100 = memref.load %arg9[%c19] : memref<25xf32, #tpu.memory_space<smem>>
    %101 = vector.extract_strided_slice %3 {offsets = [3, 4], sizes = [16, 16], strides = [1, 1]} : vector<20x20xf32> to vector<16x16xf32>
    %102 = vector.broadcast %100 : f32 to vector<16x16xf32>
    %103 = arith.mulf %102, %101 : vector<16x16xf32>
    %104 = arith.addf %99, %103 : vector<16x16xf32>
    %c20 = arith.constant 20 : index
    %105 = memref.load %arg9[%c20] : memref<25xf32, #tpu.memory_space<smem>>
    %106 = vector.extract_strided_slice %3 {offsets = [4, 0], sizes = [16, 16], strides = [1, 1]} : vector<20x20xf32> to vector<16x16xf32>
    %107 = vector.broadcast %105 : f32 to vector<16x16xf32>
    %108 = arith.mulf %107, %106 : vector<16x16xf32>
    %109 = arith.addf %104, %108 : vector<16x16xf32>
    %c21 = arith.constant 21 : index
    %110 = memref.load %arg9[%c21] : memref<25xf32, #tpu.memory_space<smem>>
    %111 = vector.extract_strided_slice %3 {offsets = [4, 1], sizes = [16, 16], strides = [1, 1]} : vector<20x20xf32> to vector<16x16xf32>
    %112 = vector.broadcast %110 : f32 to vector<16x16xf32>
    %113 = arith.mulf %112, %111 : vector<16x16xf32>
    %114 = arith.addf %109, %113 : vector<16x16xf32>
    %c22 = arith.constant 22 : index
    %115 = memref.load %arg9[%c22] : memref<25xf32, #tpu.memory_space<smem>>
    %116 = vector.extract_strided_slice %3 {offsets = [4, 2], sizes = [16, 16], strides = [1, 1]} : vector<20x20xf32> to vector<16x16xf32>
    %117 = vector.broadcast %115 : f32 to vector<16x16xf32>
    %118 = arith.mulf %117, %116 : vector<16x16xf32>
    %119 = arith.addf %114, %118 : vector<16x16xf32>
    %c23 = arith.constant 23 : index
    %120 = memref.load %arg9[%c23] : memref<25xf32, #tpu.memory_space<smem>>
    %121 = vector.extract_strided_slice %3 {offsets = [4, 3], sizes = [16, 16], strides = [1, 1]} : vector<20x20xf32> to vector<16x16xf32>
    %122 = vector.broadcast %120 : f32 to vector<16x16xf32>
    %123 = arith.mulf %122, %121 : vector<16x16xf32>
    %124 = arith.addf %119, %123 : vector<16x16xf32>
    %c24 = arith.constant 24 : index
    %125 = memref.load %arg9[%c24] : memref<25xf32, #tpu.memory_space<smem>>
    %126 = vector.extract_strided_slice %3 {offsets = [4, 4], sizes = [16, 16], strides = [1, 1]} : vector<20x20xf32> to vector<16x16xf32>
    %127 = vector.broadcast %125 : f32 to vector<16x16xf32>
    %128 = arith.mulf %127, %126 : vector<16x16xf32>
    %129 = arith.addf %124, %128 : vector<16x16xf32>
    %130 = vector.extract_strided_slice %3 {offsets = [2, 2], sizes = [16, 16], strides = [1, 1]} : vector<20x20xf32> to vector<16x16xf32>
    %c0_3 = arith.constant 0 : index
    %c0_4 = arith.constant 0 : index
    %131 = vector.load %arg12[%c0_3, %c0_4] : memref<16x16xf32, #tpu.memory_space<vmem>>, vector<16x16xf32>
    %c0_5 = arith.constant 0 : index
    %c0_6 = arith.constant 0 : index
    %c0_7 = arith.constant 0 : index
    %132 = vector.load %arg8[%c0_5, %c0_6, %c0_7] : memref<1x16x16xf32, #tpu.memory_space<vmem>>, vector<1x16x16xf32>
    %133 = vector.shape_cast %132 : vector<1x16x16xf32> to vector<16x16xf32>
    %c0_8 = arith.constant 0 : index
    %c0_9 = arith.constant 0 : index
    %c0_10 = arith.constant 0 : index
    %134 = vector.load %arg4[%c0_8, %c0_9, %c0_10] : memref<1x16x16xf32, #tpu.memory_space<vmem>>, vector<1x16x16xf32>
    %135 = vector.shape_cast %134 : vector<1x16x16xf32> to vector<16x16xf32>
    %136 = arith.mulf %135, %129 : vector<16x16xf32>
    %c0_11 = arith.constant 0 : index
    %c0_12 = arith.constant 0 : index
    %c0_13 = arith.constant 0 : index
    %137 = vector.load %arg5[%c0_11, %c0_12, %c0_13] : memref<1x16x16xf32, #tpu.memory_space<vmem>>, vector<1x16x16xf32>
    %138 = vector.shape_cast %137 : vector<1x16x16xf32> to vector<16x16xf32>
    %139 = arith.mulf %138, %133 : vector<16x16xf32>
    %140 = arith.subf %136, %139 : vector<16x16xf32>
    %c0_14 = arith.constant 0 : index
    %c0_15 = arith.constant 0 : index
    %c0_16 = arith.constant 0 : index
    %141 = vector.load %arg6[%c0_14, %c0_15, %c0_16] : memref<1x16x16xf32, #tpu.memory_space<vmem>>, vector<1x16x16xf32>
    %142 = vector.shape_cast %141 : vector<1x16x16xf32> to vector<16x16xf32>
    %143 = arith.mulf %142, %130 : vector<16x16xf32>
    %144 = arith.addf %140, %143 : vector<16x16xf32>
    %c0_17 = arith.constant 0 : index
    %c0_18 = arith.constant 0 : index
    %c0_19 = arith.constant 0 : index
    %145 = vector.load %arg7[%c0_17, %c0_18, %c0_19] : memref<1x16x16xf32, #tpu.memory_space<vmem>>, vector<1x16x16xf32>
    %146 = vector.shape_cast %145 : vector<1x16x16xf32> to vector<16x16xf32>
    %147 = arith.mulf %146, %131 : vector<16x16xf32>
    %148 = arith.subf %144, %147 : vector<16x16xf32>
    %c0_20 = arith.constant 0 : index
    %c0_21 = arith.constant 0 : index
    %149 = vector.load %arg12[%c0_20, %c0_21] : memref<16x16xf32, #tpu.memory_space<vmem>>, vector<16x16xf32>
    tpu.vector_store %arg12[%c0_20, %c0_21], %130 {strides = array<i32>} : memref<16x16xf32, #tpu.memory_space<vmem>>, vector<16x16xf32>,
    %c2_22 = arith.constant 2 : index
    %c2_23 = arith.constant 2 : index
    %150 = vector.load %arg11[%c2_22, %c2_23] : memref<20x20xf32, #tpu.memory_space<vmem>>, vector<16x16xf32>
    tpu.vector_store %arg11[%c2_22, %c2_23], %148 {strides = array<i32>} : memref<20x20xf32, #tpu.memory_space<vmem>>, vector<16x16xf32>,
    %c2_i32 = arith.constant 2 : i32
    %151 = arith.cmpi eq, %arg1, %c2_i32 : i32
    %152 = arith.extui %151 : i1 to i32
    %c0_i32_24 = arith.constant 0 : i32
    %153 = arith.cmpi ne, %152, %c0_i32_24 : i32
    scf.if %153 {
      %c0_25 = arith.constant 0 : index
      %c0_26 = arith.constant 0 : index
      %c0_27 = arith.constant 0 : index
      %154 = vector.load %arg10[%c0_25, %c0_26, %c0_27] : memref<1x16x16xf32, #tpu.memory_space<vmem>>, vector<1x16x16xf32>
      %155 = vector.shape_cast %154 : vector<1x16x16xf32> to vector<16x16xf32>
      %156 = vector.shape_cast %148 : vector<16x16xf32> to vector<1x16x16xf32>
      tpu.vector_store %arg10[%c0_25, %c0_26, %c0_27], %156 {strides = array<i32>} : memref<1x16x16xf32, #tpu.memory_space<vmem>>, vector<1x16x16xf32>,
    } else {
    }
    return
  }
  func.func @transform_0(%arg0: i32, %arg1: i32) -> (i32, i32, i32) {
    %c0_i32 = arith.constant 0 : i32
    %c0_i32_0 = arith.constant 0 : i32
    %c0_i32_1 = arith.constant 0 : i32
    return %arg0, %c0_i32, %c0_i32_0 : i32, i32, i32
  }
  func.func @transform_1(%arg0: i32, %arg1: i32) -> (i32, i32, i32) {
    %c0_i32 = arith.constant 0 : i32
    %c0_i32_0 = arith.constant 0 : i32
    %c0_i32_1 = arith.constant 0 : i32
    return %arg0, %c0_i32, %c0_i32_0 : i32, i32, i32
  }
  func.func @transform_2(%arg0: i32, %arg1: i32) -> (i32, i32, i32) {
    %c0_i32 = arith.constant 0 : i32
    %c0_i32_0 = arith.constant 0 : i32
    %c0_i32_1 = arith.constant 0 : i32
    return %arg0, %c0_i32, %c0_i32_0 : i32, i32, i32
  }
  func.func @transform_3(%arg0: i32, %arg1: i32) -> (i32, i32, i32) {
    %c0_i32 = arith.constant 0 : i32
    %c0_i32_0 = arith.constant 0 : i32
    %c0_i32_1 = arith.constant 0 : i32
    return %arg0, %c0_i32, %c0_i32_0 : i32, i32, i32
  }
  func.func @transform_4(%arg0: i32, %arg1: i32) -> (i32, i32, i32) {
    %c0_i32 = arith.constant 0 : i32
    %c0_i32_0 = arith.constant 0 : i32
    %c0_i32_1 = arith.constant 0 : i32
    return %arg0, %c0_i32, %c0_i32_0 : i32, i32, i32
  }
  func.func @transform_5(%arg0: i32, %arg1: i32) -> (i32, i32, i32) {
    %c0_i32 = arith.constant 0 : i32
    %c0_i32_0 = arith.constant 0 : i32
    %c0_i32_1 = arith.constant 0 : i32
    return %arg0, %c0_i32, %c0_i32_0 : i32, i32, i32
  }
  func.func @transform_6(%arg0: i32, %arg1: i32) -> (i32, i32, i32) {
    %c0_i32 = arith.constant 0 : i32
    %c0_i32_0 = arith.constant 0 : i32
    %c0_i32_1 = arith.constant 0 : i32
    return %arg1, %c0_i32, %c0_i32_0 : i32, i32, i32
  }
  func.func @transform_7(%arg0: i32, %arg1: i32) -> i32 {
    %c0_i32 = arith.constant 0 : i32
    %c0_i32_0 = arith.constant 0 : i32
    return %c0_i32 : i32
  }
  func.func @transform_8(%arg0: i32, %arg1: i32) -> (i32, i32, i32) {
    %c0_i32 = arith.constant 0 : i32
    %c0_i32_0 = arith.constant 0 : i32
    %c0_i32_1 = arith.constant 0 : i32
    return %arg0, %c0_i32, %c0_i32_0 : i32, i32, i32
  }
}

</mosaic_0001>

<bundles_post_ra>
// kernel: single_nonlinear2d_forward.1
= control target key start
LH: loop header
LB: loop body
LE: loop exit
PB: predicated region body
PF: predicated region fallthrough
CT: control target
= control target key end

     0   :  { %s1848_s0 = inlined_call_operand.vmem [shape: f32[2,20,20], index: 0, kind: input, shape index: {}]   ;;  %s1849_s1 = inlined_call_operand.vmem [shape: f32[2,16,16], index: 1, kind: input, shape index: {}]   ;;  %s1850_s2 = inlined_call_operand.vmem [shape: f32[2,16,16], index: 2, kind: input, shape index: {}]   ;;  %s1851_s3 = inlined_call_operand.vmem [shape: f32[2,16,16], index: 3, kind: input, shape index: {}]   ;;  %s1852_s4 = inlined_call_operand.vmem [shape: f32[2,16,16], index: 4, kind: input, shape index: {}]   ;;  %s1853_s5 = inlined_call_operand.vmem [shape: f32[2,16,16], index: 5, kind: input, shape index: {}]   ;;  %s1854_s6 = inlined_call_operand.vmem [shape: f32[3,16,16], index: 6, kind: input, shape index: {}]   ;;  %s1855_s7 = inlined_call_operand.vmem [shape: f32[25], index: 7, kind: input, shape index: {}]   ;;  %s1856_s8 = inlined_call_operand.hbm [shape: f32[2,16,16], index: 8, kind: output, shape index: {}]  }
   0x1   :  { %1866 = sst [smem:[#allocation19_spill]] %s1849_s1 }
   0x2   :  { %1867 = sst [smem:[#allocation20_spill]] %s1850_s2 }
   0x3   :  { %1868 = sst [smem:[#allocation21_spill]] %s1855_s7 }
   0x4   :  { %13 = vsyncpa [#allocation6], 0 }
   0x5   :  { %14 = vsyncpa [#allocation5], 0 }
   0x6   :  { %16 = vsyncpa [#allocation5 + $0x1], 0  ;;  %s1502_s27 = smov 0   ;;  %s1504_s28 = smov 0  }
   0x7   :  { %s1506_s29 = smov 0   ;;  %s1508_s30 = smov 0  }
   0x8   :  { %s1510_s9 = smov 0   ;;  %s1512_s10 = smov 0  }
   0x9   :  { %s1514_s11 = smov 0   ;;  %s1516_s12 = smov 0  }
   0xa LB: > { %1869 = sst [smem:[#allocation10_spill]] %s1419_s27  ;;  %s1185_s13 = sadd.s32 4294967295, %s1447_s12   ;;  %s1447_s12 = sphi %s1516_s12, %s22_s12   ;;  %s1443_s11 = sphi %s1514_s11, %s1892_s11   ;;  %s1439_s10 = sphi %s1512_s10, %s1891_s10   ;;  %s1435_s9 = sphi %s1510_s9, %s1890_s9   ;;  %s1431_s30 = sphi %s1508_s30, %s1889_s30   ;;  %s1427_s29 = sphi %s1506_s29, %s1888_s29   ;;  %s1423_s28 = sphi %s1504_s28, %s1894_s28   ;;  %s1419_s27 = sphi %s1502_s27, %s1893_s27  }
   0xb   : > { %1870 = sst [smem:[#allocation11_spill]] %s1427_s29  ;;  %s1186_s14 = sadd.s32 4294967294, %s1447_s12  }
   0xc   : > { %1871 = sst [smem:[#allocation12_spill]] %s1439_s10  ;;  %s31_s15 = sadd.s32 1, %s1439_s10 }
   0xd   : > { %1872 = sst [smem:[#allocation13_spill]] %s1443_s11  ;;  %s34_s16 = sadd.s32 1, %s1443_s11 }
   0xe   : > { %1873 = sst [smem:[#allocation14_spill]] %s1447_s12  ;;  %p32_p0 = scmp.ge.s32.totalorder %s31_s15, 3 }
   0xf   : > { %s244_s17 = sadd.s32 1, %s1427_s29  ;;  %p254_p1 = scmp.ne.s32.totalorder %s1427_s29, %s1423_s28 }
  0x10   : > { %p255_p2 = scmp.eq.s32.totalorder %s1185_s13, 5  ;;  %s1896_s15 = smov (%p32_p0, %s31_s15), 0 }
  0x11   : > { %1874 = sst [smem:[#allocation15_spill]] %s1896_s15  ;;  %s1898_s16 = smov (!%p32_p0, %s34_s16), %s1443_s11 }
  0x12   : > { %p1552_p3 = por %p255_p2, %p254_p1  ;;  %p260_p4 = scmp.ne.s32.totalorder %s1423_s28, %s1419_s27 }
  0x13   : > { %p36_p5 = scmp.ge.s32.totalorder %s1898_s16, 2  ;;  %p261_p6 = scmp.eq.s32.totalorder %s1186_s14, 5 }
  0x14   : > { %p1187_p7 = scmp.ge.s32.totalorder %s1447_s12, 1  ;;  %p268_p8 = scmp.lt.s32.totalorder %s1447_s12, 7 }
  0x15   : > { %s1900_s16 = smov (%p36_p5, %s1898_s16), 0  ;;  %p1562_p9 = por %p261_p6, %p260_p4 }
  0x16   : > { %1876 = sst [smem:[#allocation16_spill]] %s1900_s16  ;;  %p269_p10 = pnand %p1187_p7, %p268_p8 }
  0x17   : > { %s1877_s19 = scalar_select %p1562_p9, 1, 0 }
  0x18   : > { %s241_s20 = ssub.s32 %s1443_s11, %s1900_s16  ;;  %p1251_p12 = pneg %p269_p10 }
  0x19   : > { %1878 = sst [smem:[#allocation17_spill]] %s1877_s19  ;;  %p242_p11 = scmp.eq.s32.totalorder %s241_s20, 0 }
  0x1a   : > { %p1259_p13 = scmp.eq.s32.totalorder %s1185_s13, 0  ;;  %s1879_s7 = sld [smem:[#allocation21_spill]] }
  0x1b   : > { %s1572_s24 = scalar_select %p242_p11, %s1427_s29, %s244_s17  }
  0x1c   : > { %p1252_p0 = pnand %p1259_p13, %p1251_p12  ;;  %s1449_s25 = smov [#allocation4]  }
  0x1d   : > { %1880 = sst [smem:[#allocation18_spill]] %s1572_s24  ;;  %349 = sbr.rel (%p269_p10) target bundleno = 432 (0x1b0), region = 52 }
  0x20   : > { %s280_s23 = sshll.u32 %s1879_s7, 4  ;;  %s281_s23 = int_to_ptr.vmem [resolvable:$true] %s280_s23 }
  0x21   : > { %1254 = dma.vmem_to_smem (!%p1252_p0), %s281_s23, 16, %s1449_s25, [#allocation6]  }
  0x22   : > { %1410 = dma.done.wait (%p1259_p13), [#allocation6], 16  }
  0x23   : > { %1412 = vsyncadd (%p1259_p13), [#allocation6], 4294967280 }
  0x24   : > { %356 = sfence }
  0x25   : > { %s1861_s26 = sand.u32 1, %s1423_s28   ;;  %p415_p1 = scmp.lt.s32.totalorder %s1435_s9, 1 }
  0x26   : > { %s1192_s13 = sshll.u32 %s1861_s26, 4  ;;  %p445_p2 = scmp.lt.s32.totalorder %s1431_s30, 2 }
  0x27   : > { %s416_s14 = scalar_select %p415_p1, %s1435_s9, 1 }
  0x28   : > { %s446_s17 = scalar_select %p445_p2, %s1431_s30, 2 }
  0x29   : > { %s1244_s20 = smul.u32 24, %s416_s14  ;;  %s1237_s21 = sshll.u32 %s416_s14, 4 }
  0x2a   : > { %s1881_s1 = sld [smem:[#allocation19_spill]]  ;;  %s1595_s19 = scalar_lea.vmem %s1851_s3, %s1237_s21 }
  0x2b   : > { %s1882_s2 = sld [smem:[#allocation20_spill]]  ;;  %s419_s24 = scalar_lea.vmem %s1848_s0, %s1244_s20 }
  0x2c   : > { %s1600_s12 = scalar_lea.vmem %s1852_s4, %s1237_s21  ;;  %s1605_s7 = scalar_lea.vmem %s1853_s5, %s1237_s21 }
  0x2d   : > { %s1242_s16 = sshll.u32 %s446_s17, 4  ;;  %s1612_s11 = scalar_lea.vmem [#allocation7], %s1192_s13 }
  0x2e   : > { %s1610_s10 = scalar_lea.vmem %s1854_s6, %s1242_s16  ;;  %p1206_p4 = scmp.ne.s32.totalorder %s1431_s30, 0 }
  0x30   : > { %s424_s25 = scalar_lea.vmem %s1881_s1, %s1237_s21  ;;  %453 = sbr.rel (%p1206_p4) target bundleno = 59 (0x3b), region = 60 }
  0x31   : > { %s1587_s15 = scalar_lea.vmem %s1882_s2, %s1237_s21 }
  0x35   : > { %v454_v0 = vld [vmem:[%s419_s24] sm:$0xff]  ;;  %vm457_vm0 = vcmask 162816   ;;  %v455_v1 = vld [vmem:[%s419_s24 + $0x8] sm:$0xff]  ;;  %v456_v2 = vld [vmem:[%s419_s24 + $0x10] sm:$0xf]  ;;  %vm460_vm1 = vcmask 158720  }
  0x36   : > { %458 = vst.msk [vmem:[#allocation2] sm:$0xff] %vm457_vm0, %v454_v0  ;;  %v462_v3 = vld [vmem:[%s424_s25] sm:$0xff]  ;;  %vm464_vm2 = vcmask 130048   ;;  %v463_v4 = vld [vmem:[%s424_s25 + $0x8] sm:$0xff] }
  0x37   : > { %459 = vst.msk [vmem:[#allocation2 + $0x8] sm:$0xff] %vm457_vm0, %v455_v1 }
  0x38   : > { %461 = vst.msk [vmem:[#allocation2 + $0x10] sm:$0xf] %vm460_vm1, %v456_v2 }
  0x39   : > { %465 = vst.msk [vmem:[#allocation3] sm:$0xff] %vm464_vm2, %v462_v3 }
  0x3a   : > { %466 = vst.msk [vmem:[#allocation3 + $0x8] sm:$0xff] %vm464_vm2, %v463_v4 }
  0x3b PF: > { %s1208_s1 = sld [smem:[#allocation4 + $0x2]]  ;;  %s1450_s29 = smov 126   ;;  %vm540_vm3 = vcmask 1046528   ;;  %vm642_vm4 = vcmask 1045504   ;;  %vm744_vm5 = vcmask 1044480   ;;  %vm846_vm6 = vcmask 1043456  }
  0x3c   : > { %s1207_s2 = sld [smem:[#allocation4 + $0x1]]  ;;  %s1451_s26 = smov 127   ;;  %vm991_vm7 = vcmask 130048   ;;  %vm989_vm8 = vcmask 130050   ;;  %vm993_vm9 = vcmask 123904   ;;  %vm1003_vm10 = vcmask 146448  }
  0x3d   : > { %v1615_v5 = vld [vmem:[#allocation2] sm:$0xff]  ;;  %s1209_s27 = sld [smem:[#allocation4 + $0x3]]  ;;  %s1452_s20 = smov 125  }
  0x3e   : > { %s1210_s24 = sld [smem:[#allocation4 + $0x4]]  ;;  %v1620_v10 = vld [vmem:[#allocation2 + $0x8] sm:$0xff]  ;;  %s1453_s25 = smov 124  }
  0x3f   : > { %s1212_s13 = sld [smem:[#allocation4 + $0x6]]  ;;  %v1631_v20 = vld [vmem:[#allocation2 + $0x10] sm:$0xf]  ;;  %p1231_p5 = scmp.ne.s32.totalorder %s1431_s30, 2 }
  0x40   : > { %s1213_s17 = sld [smem:[#allocation4 + $0x7]] }
  0x41   : > { %v491_v6 = vstv %s1208_s1  ;;  %s1214_s21 = sld [smem:[#allocation4 + $0x8]] }
  0x42   : > { %v492_v7 = vmul.f32 %v491_v6, %v1615_v5  ;;  %v477_v8 = vstv %s1207_s2  ;;  %v493_v13 = vmul.f32 %v491_v6, %v1620_v10  ;;  %s1215_s14 = sld [smem:[#allocation4 + $0x9]] }
  0x43   : > { %v478_v9 = vmul.f32 %v477_v8, %v1615_v5  ;;  %v505_v11 = vstv %s1209_s27  ;;  %v479_v14 = vmul.f32 %v477_v8, %v1620_v10  ;;  %s1217_s22 = sld [smem:[#allocation4 + $0xb]] }
  0x44   : > { %496 = vrot.lane.b32.xlu1 %v492_v7, %s1450_s29  ;;  %v506_v12 = vmul.f32 %v505_v11, %v1615_v5  ;;  %v519_v15 = vstv %s1210_s24  ;;  %v507_v17 = vmul.f32 %v505_v11, %v1620_v10  ;;  %s1218_s23 = sld [smem:[#allocation4 + $0xc]] }
  0x45   : > { %482 = vrot.lane.b32.xlu0 %v478_v9, %s1451_s26  ;;  %v551_v16 = vstv %s1212_s13  ;;  %v521_v21 = vmul.f32 %v519_v15, %v1620_v10  ;;  %v520_v23 = vmul.f32 %v519_v15, %v1615_v5  ;;  %s1219_s16 = sld [smem:[#allocation4 + $0xd]] }
  0x46   : > { %510 = vrot.lane.b32.xlu2 %v506_v12, %s1452_s20  ;;  %v572_v18 = vstv %s1213_s17  ;;  %v552_v19 = vmul.f32 %v551_v16, %v1615_v5  ;;  %v553_v22 = vmul.f32 %v551_v16, %v1620_v10  ;;  %v554_v26 = vmul.f32 %v551_v16, %v1631_v20  ;;  %s1220_s1 = sld [smem:[#allocation4 + $0xe]] }
  0x47   : > { %v573_v24 = vmul.f32 %v572_v18, %v1615_v5  ;;  %v574_v25 = vmul.f32 %v572_v18, %v1620_v10  ;;  %v593_v32 = vstv %s1214_s21  ;;  %v575_v34 = vmul.f32 %v572_v18, %v1631_v20  ;;  %s1222_s2 = sld [smem:[#allocation4 + $0x10]] }
  0x48   : > { %v558_v27 = vrot.slane %v552_v19, 1  ;;  %v559_v28 = vrot.slane %v553_v22, 1  ;;  %v561_v31 = vrot.slane %v554_v26, 1  ;;  %v595_v36 = vmul.f32 %v593_v32, %v1620_v10  ;;  %s1223_s27 = sld [smem:[#allocation4 + $0x11]] }
  0x49   : > { %v579_v29 = vrot.slane %v573_v24, 1  ;;  %v580_v30 = vrot.slane %v574_v25, 1  ;;  %v596_v37 = vmul.f32 %v593_v32, %v1631_v20  ;;  %v594_v39 = vmul.f32 %v593_v32, %v1615_v5  ;;  %s1224_s24 = sld [smem:[#allocation4 + $0x12]] }
  0x4a   : > { %v560_v33 = vsel %vm540_vm3, %v558_v27, %v559_v28  ;;  %v562_v38 = vsel %vm540_vm3, %v559_v28, %v561_v31  ;;  %v582_v40 = vrot.slane %v575_v34, 1  ;;  %v601_v41 = vrot.slane %v595_v36, 1  ;;  %s1225_s13 = sld [smem:[#allocation4 + $0x13]] }
  0x4b   : > { %v581_v35 = vsel %vm540_vm3, %v579_v29, %v580_v30  ;;  %v603_v42 = vrot.slane %v596_v37, 1  ;;  %v614_v43 = vstv %s1215_s14  ;;  %v600_v44 = vrot.slane %v594_v39, 1  ;;  %s1227_s17 = sld [smem:[#allocation4 + $0x15]] }
  0x4c   : > { %498 = vrot.lane.b32.xlu1 %v493_v13, %s1450_s29  ;;  %v653_v45 = vstv %s1217_s22  ;;  %v583_v46 = vsel %vm540_vm3, %v580_v30, %v582_v40  ;;  %v615_v47 = vmul.f32 %v614_v43, %v1615_v5  ;;  %v616_v48 = vmul.f32 %v614_v43, %v1620_v10  ;;  %s1228_s21 = sld [smem:[#allocation4 + $0x16]] }
  0x4d   : > { %484 = vrot.lane.b32.xlu0 %v479_v14, %s1451_s26  ;;  %v604_v49 = vsel %vm540_vm3, %v601_v41, %v603_v42  ;;  %v654_v50 = vmul.f32 %v653_v45, %v1615_v5  ;;  %v655_v51 = vmul.f32 %v653_v45, %v1620_v10  ;;  %v602_v52 = vsel %vm540_vm3, %v600_v44, %v601_v41  ;;  %s1229_s14 = sld [smem:[#allocation4 + $0x17]] }
  0x4e   : > { %512 = vrot.lane.b32.xlu2 %v507_v17, %s1452_s20  ;;  %v617_v53 = vmul.f32 %v614_v43, %v1631_v20  ;;  %v621_v54 = vrot.slane %v615_v47, 1  ;;  %v622_v55 = vrot.slane %v616_v48, 1  ;;  %v674_v59 = vstv %s1218_s23  ;;  %s1230_s22 = sld [smem:[#allocation4 + $0x18]] }
  0x4f   : > { %v660_v56 = vrot.slane %v654_v50, 2  ;;  %v661_v57 = vrot.slane %v655_v51, 2  ;;  %v656_v61 = vmul.f32 %v653_v45, %v1631_v20  ;;  %v676_v63 = vmul.f32 %v674_v59, %v1620_v10  ;;  %s1226_s23 = sld [smem:[#allocation4 + $0x14]] }
  0x50   : > { %v624_v58 = vrot.slane %v617_v53, 1  ;;  %v623_v60 = vsel %vm540_vm3, %v621_v54, %v622_v55  ;;  %v677_v0 = vmul.f32 %v674_v59, %v1631_v20  ;;  %v675_v2 = vmul.f32 %v674_v59, %v1615_v5 }
  0x51   : > { %v662_v62 = vsel %vm642_vm4, %v660_v56, %v661_v57  ;;  %v663_v3 = vrot.slane %v656_v61, 2  ;;  %v682_v4 = vrot.slane %v676_v63, 2  ;;  %v695_v7 = vstv %s1219_s16 }
  0x52   : > { %v625_v1 = vsel %vm540_vm3, %v622_v55, %v624_v58  ;;  %v684_v6 = vrot.slane %v677_v0, 2  ;;  %v681_v8 = vrot.slane %v675_v2, 2  ;;  %v716_v9 = vstv %s1220_s1 }
  0x53   : > { %v664_v11 = vsel %vm642_vm4, %v661_v57, %v663_v3  ;;  %v696_v12 = vmul.f32 %v695_v7, %v1615_v5  ;;  %v697_v13 = vmul.f32 %v695_v7, %v1620_v10  ;;  %v717_v15 = vmul.f32 %v716_v9, %v1615_v5 }
  0x54   : > { %526 = vrot.lane.b32.xlu1 %v521_v21, %s1453_s25  ;;  %v685_v14 = vsel %vm642_vm4, %v682_v4, %v684_v6  ;;  %v718_v16 = vmul.f32 %v716_v9, %v1620_v10  ;;  %v683_v17 = vsel %vm642_vm4, %v681_v8, %v682_v4  ;;  %v698_v18 = vmul.f32 %v695_v7, %v1631_v20 }
  0x55   : > { %524 = vrot.lane.b32.xlu0 %v520_v23, %s1453_s25  ;;  %v702_v19 = vrot.slane %v696_v12, 2  ;;  %v703_v21 = vrot.slane %v697_v13, 2  ;;  %v723_v22 = vrot.slane %v717_v15, 2  ;;  %v755_v25 = vstv %s1222_s2 }
  0x56   : > { %563 = vrot.lane.b32.xlu2 %v560_v33, %s1451_s26  ;;  %v724_v23 = vrot.slane %v718_v16, 2  ;;  %v705_v24 = vrot.slane %v698_v18, 2  ;;  %v719_v27 = vmul.f32 %v716_v9, %v1631_v20  ;;  %v757_v29 = vmul.f32 %v755_v25, %v1620_v10 }
  0x57   : > { %v704_v26 = vsel %vm642_vm4, %v702_v19, %v703_v21  ;;  %v758_v30 = vmul.f32 %v755_v25, %v1631_v20  ;;  %v756_v32 = vmul.f32 %v755_v25, %v1615_v5  ;;  %v776_v36 = vstv %s1223_s27 }
  0x58   : > { %v725_v28 = vsel %vm642_vm4, %v723_v22, %v724_v23  ;;  %v706_v31 = vsel %vm642_vm4, %v703_v21, %v705_v24  ;;  %v726_v33 = vrot.slane %v719_v27, 2  ;;  %v763_v34 = vrot.slane %v757_v29, 3 }
  0x59   : > { %v762_v37 = vrot.slane %v756_v32, 3  ;;  %v777_v40 = vmul.f32 %v776_v36, %v1615_v5  ;;  %v778_v41 = vmul.f32 %v776_v36, %v1620_v10  ;;  %v857_v63 = vstv %s1227_s17 }
  0x5a   : > { %v727_v39 = vsel %vm642_vm4, %v724_v23, %v726_v33  ;;  %v858_v3 = vmul.f32 %v857_v63, %v1615_v5  ;;  %v859_v4 = vmul.f32 %v857_v63, %v1620_v10  ;;  %v920_v29 = vstv %s1230_s22 }
  0x5b   : > { %v764_v45 = vsel %vm744_vm5, %v762_v37, %v763_v34  ;;  %v783_v47 = vrot.slane %v777_v40, 3  ;;  %v784_v48 = vrot.slane %v778_v41, 3  ;;  %v921_v32 = vmul.f32 %v920_v29, %v1615_v5 }
  0x5c   : > { %584 = vrot.lane.b32.xlu1 %v581_v35, %s1450_s29  ;;  %v765_v35 = vrot.slane %v758_v30, 3  ;;  %v864_v12 = vrot.slane %v858_v3, 4  ;;  %v865_v13 = vrot.slane %v859_v4, 4  ;;  %v922_v33 = vmul.f32 %v920_v29, %v1620_v10 }
  0x5d   : > { %565 = vrot.lane.b32.xlu0 %v562_v38, %s1451_s26  ;;  %v797_v38 = vstv %s1224_s24  ;;  %v785_v53 = vsel %vm744_vm5, %v783_v47, %v784_v48  ;;  %v927_v37 = vrot.slane %v921_v32, 4  ;;  %v959_v40 = vrot.slane %v1615_v5, 2 }
  0x5e   : > { %586 = vrot.lane.b32.xlu2 %v583_v46, %s1450_s29  ;;  %v766_v42 = vsel %vm744_vm5, %v763_v34, %v765_v35  ;;  %v798_v43 = vmul.f32 %v797_v38, %v1615_v5  ;;  %v799_v44 = vmul.f32 %v797_v38, %v1620_v10  ;;  %v779_v46 = vmul.f32 %v776_v36, %v1631_v20 }
  0x5f   : > { %v800_v54 = vmul.f32 %v797_v38, %v1631_v20  ;;  %v866_v18 = vsel %vm846_vm6, %v864_v12, %v865_v13  ;;  %v923_v36 = vmul.f32 %v920_v29, %v1631_v20  ;;  %v960_v41 = vrot.slane %v1620_v10, 2 }
  0x60   : > { %v805_v50 = vrot.slane %v799_v44, 3  ;;  %v786_v51 = vrot.slane %v779_v46, 3  ;;  %v962_v46 = vrot.slane %v1631_v20, 2 }
  0x61   : > { %v961_v44 = vsel %vm642_vm4, %v959_v40, %v960_v41 }
  0x62   : > { %v787_v58 = vsel %vm744_vm5, %v784_v48, %v786_v51  ;;  %v963_v48 = vsel %vm642_vm4, %v960_v41, %v962_v46 }
  0x64   : > { %607 = vrot.lane.b32.xlu1 %v604_v49, %s1452_s20  ;;  %v804_v49 = vrot.slane %v798_v43, 3 }
  0x65   : > { %605 = vrot.lane.b32.xlu0 %v602_v52, %s1452_s20  ;;  %v818_v52 = vstv %s1225_s13 }
  0x66   : > { %626 = vrot.lane.b32.xlu2 %v623_v60, %s1453_s25  ;;  %v806_v55 = vsel %vm744_vm5, %v804_v49, %v805_v50  ;;  %v820_v56 = vmul.f32 %v818_v52, %v1620_v10  ;;  %v821_v57 = vmul.f32 %v818_v52, %v1631_v20  ;;  %v819_v59 = vmul.f32 %v818_v52, %v1615_v5 }
  0x67   : > { %v807_v60 = vrot.slane %v800_v54, 3 }
  0x68   : > { %v826_v61 = vrot.slane %v820_v56, 3  ;;  %v825_v0 = vrot.slane %v819_v59, 3 }
  0x69   : > { %v808_v2 = vsel %vm744_vm5, %v805_v50, %v807_v60 }
  0x6a   : > { %v827_v9 = vsel %vm744_vm5, %v825_v0, %v826_v61 }
  0x6c   : > { %665 = vrot.lane.b32.xlu1 %v662_v62, %s1451_s26  ;;  %v828_v62 = vrot.slane %v821_v57, 3 }
  0x6d   : > { %628 = vrot.lane.b32.xlu0 %v625_v1, %s1453_s25  ;;  %v878_v1 = vstv %s1228_s21 }
  0x6e   : > { %667 = vrot.lane.b32.xlu2 %v664_v11, %s1451_s26  ;;  %v829_v6 = vsel %vm744_vm5, %v826_v61, %v828_v62  ;;  %v879_v7 = vmul.f32 %v878_v1, %v1615_v5  ;;  %v880_v8 = vmul.f32 %v878_v1, %v1620_v10  ;;  %v860_v11 = vmul.f32 %v857_v63, %v1631_v20 }
  0x6f   : > { %v881_v19 = vmul.f32 %v878_v1, %v1631_v20 }
  0x70   : > { %v886_v15 = vrot.slane %v880_v8, 4  ;;  %v867_v16 = vrot.slane %v860_v11, 4 }
  0x72   : > { %v868_v24 = vsel %vm846_vm6, %v865_v13, %v867_v16 }
  0x74   : > { %688 = vrot.lane.b32.xlu1 %v685_v14, %s1450_s29  ;;  %v885_v14 = vrot.slane %v879_v7, 4 }
  0x75   : > { %686 = vrot.lane.b32.xlu0 %v683_v17, %s1450_s29  ;;  %v899_v17 = vstv %s1229_s14 }
  0x76   : > { %707 = vrot.lane.b32.xlu2 %v704_v26, %s1452_s20  ;;  %v887_v21 = vsel %vm846_vm6, %v885_v14, %v886_v15  ;;  %v901_v22 = vmul.f32 %v899_v17, %v1620_v10  ;;  %v902_v23 = vmul.f32 %v899_v17, %v1631_v20  ;;  %v900_v25 = vmul.f32 %v899_v17, %v1615_v5 }
  0x77   : > { %v888_v26 = vrot.slane %v881_v19, 4 }
  0x78   : > { %v907_v27 = vrot.slane %v901_v22, 4  ;;  %v906_v30 = vrot.slane %v900_v25, 4 }
  0x7a   : > { %v908_v35 = vsel %vm846_vm6, %v906_v30, %v907_v27 }
  0x7c   : > { %728 = vrot.lane.b32.xlu1 %v725_v28, %s1453_s25  ;;  %v909_v28 = vrot.slane %v902_v23, 4 }
  0x7d   : > { %709 = vrot.lane.b32.xlu0 %v706_v31, %s1452_s20  ;;  %v889_v31 = vsel %vm846_vm6, %v886_v15, %v888_v26 }
  0x7e   : > { %730 = vrot.lane.b32.xlu2 %v727_v39, %s1453_s25  ;;  %v910_v34 = vsel %vm846_vm6, %v907_v27, %v909_v28  ;;  %v928_v39 = vrot.slane %v922_v33, 4 }
  0x80   : > { %v929_v43 = vsel %vm846_vm6, %v927_v37, %v928_v39 }
  0x84   : > { %769 = vrot.lane.b32.xlu1 %v766_v42, %s1451_s26  ;;  %v930_v42 = vrot.slane %v923_v36, 4 }
  0x85   : > { %767 = vrot.lane.b32.xlu0 %v764_v45, %s1451_s26 }
  0x86   : > { %788 = vrot.lane.b32.xlu2 %v785_v53, %s1450_s29  ;;  %v931_v45 = vsel %vm846_vm6, %v928_v39, %v930_v42 }
  0x8c   : > { %809 = vrot.lane.b32.xlu1 %v806_v55, %s1452_s20 }
  0x8d   : > { %790 = vrot.lane.b32.xlu0 %v787_v58, %s1450_s29 }
  0x8e   : > { %811 = vrot.lane.b32.xlu2 %v808_v2, %s1452_s20 }
  0x94   : > { %832 = vrot.lane.b32.xlu1 %v829_v6, %s1453_s25 }
  0x95   : > { %830 = vrot.lane.b32.xlu0 %v827_v9, %s1453_s25 }
  0x96   : > { %869 = vrot.lane.b32.xlu2 %v866_v18, %s1451_s26 }
  0x9c   : > { %890 = vrot.lane.b32.xlu1 %v887_v21, %s1450_s29 }
  0x9d   : > { %871 = vrot.lane.b32.xlu0 %v868_v24, %s1451_s26  ;;  %s470_s26 = sld [smem:[#allocation4]] }
  0x9e   : > { %892 = vrot.lane.b32.xlu2 %v889_v31, %s1450_s29 }
  0xa0   : > { %v511_v38 = vpop.permute.xlu2 %510 }
  0xa3   : > { %v471_v59 = vstv %s470_s26 }
  0xa4   : > { %913 = vrot.lane.b32.xlu1 %v910_v34, %s1452_s20  ;;  %v472_v62 = vmul.f32 %v471_v59, %v1615_v5  ;;  %v473_v3 = vmul.f32 %v471_v59, %v1620_v10 }
  0xa5   : > { %911 = vrot.lane.b32.xlu0 %v908_v35, %s1452_s20  ;;  %s1211_s20 = sld [smem:[#allocation4 + $0x5]] }
  0xa6   : > { %932 = vrot.lane.b32.xlu2 %v929_v43, %s1453_s25 }
  0xa8   : > { %v513_v47 = vpop.permute.xlu2 %512 }
  0xab   : > { %v533_v0 = vstv %s1211_s20 }
  0xac   : > { %964 = vrot.lane.b32.xlu1 %v961_v44, %s1450_s29  ;;  %v534_v4 = vmul.f32 %v533_v0, %v1615_v5  ;;  %v535_v6 = vmul.f32 %v533_v0, %v1620_v10  ;;  %v536_v15 = vmul.f32 %v533_v0, %v1631_v20 }
  0xad   : > { %934 = vrot.lane.b32.xlu0 %v931_v45, %s1453_s25  ;;  %s1221_s25 = sld [smem:[#allocation4 + $0xf]] }
  0xae   : > { %966 = vrot.lane.b32.xlu2 %v963_v48, %s1450_s29  ;;  %v541_v11 = vrot.slane %v534_v4, 1  ;;  %v542_v12 = vrot.slane %v535_v6, 1  ;;  %v544_v21 = vrot.slane %v536_v15, 1 }
  0xb0   : > { %v564_v49 = vpop.permute.xlu2 %563  ;;  %v543_v19 = vsel %vm540_vm3, %v541_v11, %v542_v12  ;;  %v545_v28 = vsel %vm540_vm3, %v542_v12, %v544_v21 }
  0xb4   : > { %982 = vrot.lane.b32.xlu1 %v1620_v10, %s1450_s29 }
  0xb5   : > { %980 = vrot.lane.b32.xlu0 %v1615_v5, %s1450_s29 }
  0xb6   : > { %v497_v50 = vpop.permute.xlu1 %496  ;;  %984 = vrot.lane.b32.xlu2 %v1631_v20, %s1450_s29  ;;  %s1216_s29 = sld [smem:[#allocation4 + $0xa]] }
  0xb7   : > { %v483_v51 = vpop.permute.xlu0 %482 }
  0xb8   : > { %v587_v52 = vpop.permute.xlu2 %586  ;;  %v488_v63 = vadd.f32 %v483_v51, %v472_v62 }
  0xba   : > { %v502_v7 = vadd.f32 %v497_v50, %v488_v63  ;;  %v737_v50 = vstv %s1221_s25 }
  0xbc   : > { %v516_v13 = vadd.f32 %v511_v38, %v502_v7  ;;  %v635_v26 = vstv %s1216_s29 }
  0xbd   : > { %v636_v31 = vmul.f32 %v635_v26, %v1615_v5  ;;  %v637_v32 = vmul.f32 %v635_v26, %v1620_v10  ;;  %v638_v39 = vmul.f32 %v635_v26, %v1631_v20 }
  0xbe   : > { %v499_v53 = vpop.permute.xlu1 %498 }
  0xbf   : > { %v485_v54 = vpop.permute.xlu0 %484  ;;  %v643_v37 = vrot.slane %v636_v31, 2  ;;  %v644_v38 = vrot.slane %v637_v32, 2  ;;  %v646_v46 = vrot.slane %v638_v39, 2 }
  0xc0   : > { %v627_v57 = vpop.permute.xlu2 %626  ;;  %v489_v9 = vadd.f32 %v485_v54, %v473_v3 }
  0xc1   : > { %v645_v45 = vsel %vm642_vm4, %v643_v37, %v644_v38  ;;  %v647_v51 = vsel %vm642_vm4, %v644_v38, %v646_v46  ;;  %v944_v46 = vld [vmem:[%s1587_s15] sm:$0xff] }
  0xc2   : > { %v503_v17 = vadd.f32 %v499_v53, %v489_v9 }
  0xc4   : > { %v517_v22 = vadd.f32 %v513_v47, %v503_v17 }
  0xc6   : > { %v527_v55 = vpop.permute.xlu1 %526 }
  0xc7   : > { %v525_v56 = vpop.permute.xlu0 %524  ;;  %v531_v25 = vadd.f32 %v527_v55, %v517_v22  ;;  %v739_v55 = vmul.f32 %v737_v50, %v1620_v10 }
  0xc8   : > { %v1762_v61 = vpop.permute.xlu2 %667  ;;  %v530_v18 = vadd.f32 %v525_v56, %v516_v13  ;;  %v738_v56 = vmul.f32 %v737_v50, %v1615_v5  ;;  %v839_v13 = vstv %s1226_s23 }
  0xc9   : > { %v549_v34 = vadd.f32 %v545_v28, %v531_v25  ;;  %v842_v28 = vmul.f32 %v839_v13, %v1631_v20 }
  0xca   : > { %v548_v23 = vadd.f32 %v543_v19, %v530_v18  ;;  %v745_v62 = vrot.slane %v738_v56, 3  ;;  %v949_v56 = vld [vmem:[%s1595_s19 + $0x8] sm:$0xff] }
  0xcc   : > { %v569_v30 = vadd.f32 %v564_v49, %v548_v23 }
  0xce   : > { %v585_v58 = vpop.permute.xlu1 %584 }
  0xcf   : > { %v566_v60 = vpop.permute.xlu0 %565  ;;  %v590_v33 = vadd.f32 %v585_v58, %v569_v30 }
  0xd0   : > { %v708_v8 = vpop.permute.xlu2 %707  ;;  %v570_v35 = vadd.f32 %v566_v60, %v549_v34 }
  0xd2   : > { %v591_v43 = vadd.f32 %v587_v52, %v570_v35 }
  0xd6   : > { %v608_v1 = vpop.permute.xlu1 %607 }
  0xd7   : > { %v606_v2 = vpop.permute.xlu0 %605  ;;  %v612_v47 = vadd.f32 %v608_v1, %v591_v43  ;;  %v740_v1 = vmul.f32 %v737_v50, %v1631_v20 }
  0xd8   : > { %v731_v24 = vpop.permute.xlu2 %730  ;;  %v611_v36 = vadd.f32 %v606_v2, %v590_v33 }
  0xd9   : > { %v748_v11 = vrot.slane %v740_v1, 3 }
  0xda   : > { %v632_v44 = vadd.f32 %v627_v57, %v611_v36  ;;  %v746_v57 = vrot.slane %v739_v55, 3  ;;  %v943_v55 = vld [vmem:[%s1610_s10 + $0x8] sm:$0xff] }
  0xdc   : > { %v650_v48 = vadd.f32 %v645_v45, %v632_v44  ;;  %v747_v6 = vsel %vm744_vm5, %v745_v62, %v746_v57  ;;  %v749_v17 = vsel %vm744_vm5, %v746_v57, %v748_v11  ;;  %v942_v44 = vld [vmem:[%s1610_s10] sm:$0xff]  ;;  %v945_v57 = vld [vmem:[%s1587_s15 + $0x8] sm:$0xff] }
  0xdd   : > { %v948_v45 = vld [vmem:[%s1595_s19] sm:$0xff]  ;;  %s1454_s19 = smov 2  }
  0xde   : > { %v666_v14 = vpop.permute.xlu1 %665 }
  0xdf   : > { %v629_v16 = vpop.permute.xlu0 %628  ;;  %v671_v53 = vadd.f32 %v666_v14, %v650_v48  ;;  %v950_v48 = vmul.f32 %v948_v45, %v942_v44 }
  0xe0   : > { %v789_v42 = vpop.permute.xlu2 %788  ;;  %v633_v49 = vadd.f32 %v629_v16, %v612_v47 }
  0xe2   : > { %v651_v59 = vadd.f32 %v647_v51, %v633_v49  ;;  %v954_v51 = vld [vmem:[%s1600_s12] sm:$0xff] }
  0xe4   : > { %v672_v63 = vadd.f32 %v1762_v61, %v651_v59  ;;  %v840_v61 = vmul.f32 %v839_v13, %v1615_v5  ;;  %v850_v5 = vrot.slane %v842_v28, 4 }
  0xe6   : > { %v689_v27 = vpop.permute.xlu1 %688  ;;  %v847_v23 = vrot.slane %v840_v61, 4 }
  0xe7   : > { %v687_v29 = vpop.permute.xlu0 %686  ;;  %v693_v2 = vadd.f32 %v689_v27, %v672_v63  ;;  %v955_v63 = vld [vmem:[%s1600_s12 + $0x8] sm:$0xff] }
  0xe8   : > { %v692_v60 = vadd.f32 %v687_v29, %v671_v53  ;;  %v812_v52 = vpop.permute.xlu2 %811  ;;  %v940_v53 = vld [vmem:[#allocation3] sm:$0xff] }
  0xea   : > { %v713_v0 = vadd.f32 %v708_v8, %v692_v60  ;;  %v841_v8 = vmul.f32 %v839_v13, %v1620_v10 }
  0xec   : > { %v848_v25 = vrot.slane %v841_v8, 4 }
  0xee   : > { %v729_v40 = vpop.permute.xlu1 %728  ;;  %v851_v36 = vsel %vm846_vm6, %v848_v25, %v850_v5 }
  0xef   : > { %v710_v41 = vpop.permute.xlu0 %709  ;;  %v734_v3 = vadd.f32 %v729_v40, %v713_v0 }
  0xf0   : > { %v714_v9 = vadd.f32 %v710_v41, %v693_v2  ;;  %v870_v14 = vpop.permute.xlu2 %869 }
  0xf1   : > { %v752_v12 = vadd.f32 %v747_v6, %v734_v3  ;;  %v951_v3 = vmul.f32 %v949_v56, %v943_v55  ;;  %v941_v6 = vld [vmem:[#allocation3 + $0x8] sm:$0xff] }
  0xf2   : > { %v735_v15 = vadd.f32 %v731_v24, %v714_v9  ;;  %v849_v24 = vsel %vm846_vm6, %v847_v23, %v848_v25 }
  0xf4   : > { %v753_v21 = vadd.f32 %v749_v17, %v735_v15 }
  0xf6   : > { %v770_v54 = vpop.permute.xlu1 %769 }
  0xf7   : > { %v768_v58 = vpop.permute.xlu0 %767  ;;  %v774_v26 = vadd.f32 %v770_v54, %v753_v21  ;;  %v974_v54 = vld [vmem:[%s1605_s7] sm:$0xff] }
  0xf8   : > { %v773_v16 = vadd.f32 %v768_v58, %v752_v12  ;;  %v893_v31 = vpop.permute.xlu2 %892  ;;  %v976_v1 = vmul.f32 %v974_v54, %v940_v53 }
  0xfa   : > { %v794_v22 = vadd.f32 %v789_v42, %v773_v16 }
  0xfe   : > { %v810_v4 = vpop.permute.xlu1 %809 }
  0xff   : > { %v791_v7 = vpop.permute.xlu0 %790  ;;  %v815_v27 = vadd.f32 %v810_v4, %v794_v22 }
 0x100   : > { %v795_v29 = vadd.f32 %v791_v7, %v774_v26  ;;  %v933_v41 = vpop.permute.xlu2 %932  ;;  %v975_v7 = vld [vmem:[%s1605_s7 + $0x8] sm:$0xff] }
 0x102   : > { %v816_v33 = vadd.f32 %v812_v52, %v795_v29 }
 0x106   : > { %v833_v18 = vpop.permute.xlu1 %832 }
 0x107   : > { %v831_v19 = vpop.permute.xlu0 %830  ;;  %v837_v35 = vadd.f32 %v833_v18, %v816_v33 }
 0x108   : > { %v836_v30 = vadd.f32 %v831_v19, %v815_v27  ;;  %v967_v0 = vpop.permute.xlu2 %966 }
 0x109   : > { %v855_v20 = vadd.f32 %v851_v36, %v837_v35  ;;  %v971_v11 = vmul.f32 %v967_v0, %v955_v63 }
 0x10a   : > { %v854_v34 = vadd.f32 %v849_v24, %v836_v30 }
 0x10c   : > { %v875_v37 = vadd.f32 %v870_v14, %v854_v34  ;;  %v977_v14 = vmul.f32 %v975_v7, %v941_v6 }
 0x10e   : > { %v891_v32 = vpop.permute.xlu1 %890 }
 0x10f   : > { %v872_v10 = vpop.permute.xlu0 %871  ;;  %v896_v38 = vadd.f32 %v891_v32, %v875_v37 }
 0x110   : > { %v876_v42 = vadd.f32 %v872_v10, %v855_v20  ;;  %v985_v8 = vpop.permute.xlu2 %984 }
 0x111   : > { %994 = vst.msk [vmem:[#allocation3 + $0xe] sm:$0x3] %vm993_vm9, %v985_v8 }
 0x112   : > { %v897_v49 = vadd.f32 %v893_v31, %v876_v42 }
 0x116   : > { %v914_v39 = vpop.permute.xlu1 %913 }
 0x117   : > { %v912_v40 = vpop.permute.xlu0 %911  ;;  %v918_v58 = vadd.f32 %v914_v39, %v897_v49 }
 0x118   : > { %v917_v43 = vadd.f32 %v912_v40, %v896_v38 }
 0x11a   : > { %v938_v47 = vadd.f32 %v933_v41, %v917_v43 }
 0x11c   : > { %v946_v50 = vmul.f32 %v944_v46, %v938_v47 }
 0x11e   : > { %v965_v59 = vpop.permute.xlu1 %964  ;;  %v952_v60 = vsub.f32 %v946_v50, %v950_v48 }
 0x11f   : > { %v970_v52 = vmul.f32 %v965_v59, %v954_v51  ;;  %v935_v62 = vpop.permute.xlu0 %934 }
 0x120   : > { %v939_v2 = vadd.f32 %v935_v62, %v918_v58 }
 0x121   : > { %v972_v4 = vadd.f32 %v970_v52, %v952_v60 }
 0x122   : > { %v947_v9 = vmul.f32 %v945_v57, %v939_v2 }
 0x123   : > { %v978_v12 = vsub.f32 %v972_v4, %v976_v1 }
 0x124   : > { %v953_v13 = vsub.f32 %v947_v9, %v951_v3 }
 0x125   : > { %997 = vrot.lane.b32.xlu0 %v978_v12, %s1454_s19 }
 0x126   : > { %v973_v15 = vadd.f32 %v971_v11, %v953_v13  ;;  %v983_v16 = vpop.permute.xlu1 %982 }
 0x127   : > { %v981_v17 = vpop.permute.xlu0 %980  ;;  %992 = vst.msk [vmem:[#allocation3 + $0x6] sm:$0xff] %vm991_vm7, %v983_v16 }
 0x128   : > { %v979_v61 = vsub.f32 %v973_v15, %v977_v14  ;;  %990 = vst.msk [vmem:[#allocation3 - $0x2] sm:$0xfc] %vm989_vm8, %v981_v17 }
 0x12a   : > { %999 = vrot.lane.b32.xlu1 %v979_v61, %s1454_s19 }
 0x197   : > { %v998_v18 = vpop.permute.xlu0 %997 }
 0x198   : > { %1004 = vst.msk [vmem:[#allocation2 + $0x2] sm:$0xff] %vm1003_vm10, %v998_v18 }
 0x199   : > { %1009 = sbr.rel (%p1231_p5) target bundleno = 416 (0x1a0), region = 64 }
 0x19c   : > { %v1000_v19 = vpop.permute.xlu1 %999 }
 0x19d   : > { %1005 = vst.msk [vmem:[#allocation2 + $0xa] sm:$0xff] %vm1003_vm10, %v1000_v19 }
 0x19e   : > { %1010 = vst.msk [vmem:[%s1612_s11] sm:$0xff] %vm991_vm7, %v978_v12 }
 0x19f   : > { %1011 = vst.msk [vmem:[%s1612_s11 + $0x8] sm:$0xff] %vm991_vm7, %v979_v61 }
 0x1a0 PF: > { %s1243_s12 = sshll.u32 %s1435_s9, 4  ;;  %s1025_s16 = sshll.u32 %s1612_s11, 4  ;;  %s1026_s16 = int_to_ptr.vmem [resolvable:$true] %s1025_s16 }
 0x1a1   : > { %s1024_s10 = scalar_lea.hbm %s1856_s8, %s1243_s12  ;;  %s1883_s1 = sand.u32 1, %s1423_s28  }
 0x1a2   : > { %s1027_s30 = sshll.u32 %s1024_s10, 4  ;;  %s1013_s2 = scalar_lea.sflag [#allocation5], %s1883_s1  ;;  %s1028_s30 = int_to_ptr.hbm [resolvable:$true] %s1027_s30 }
 0x1a3   : > { %s1363_s27 = sshra.s32 %s1028_s30, 4  ;;  %s1369_s9 = scalar_lea.hbm %s1856_s8, 32  ;;  %s1364_s27 = int_to_ptr.hbm [resolvable:$true] %s1363_s27 }
 0x1a4   : > { %s1365_s24 = scalar_lea.hbm %s1364_s27, 16  ;;  %p1370_p10 = scmp.lt.s32.totalorder %s1364_s27, %s1856_s8 }
 0x1a5   : > { %p1366_p6 = scmp.ne.s32.totalorder %s1364_s27, %s1365_s24  ;;  %p1371_p11 = scmp.lt.s32.totalorder %s1369_s9, %s1365_s24 }
 0x1a7   : > { %p1367_p7 = pnand %p1366_p6, %p1552_p3  ;;  %p1372_p12 = por %p1371_p11, %p1370_p10 }
 0x1a9   : > { %p1368_p8 = pneg %p1367_p7 }
 0x1ab   : > { %p1373_p13 = pnand %p1372_p12, %p1368_p8 }
 0x1ad   : > { %1376 = shalt.err (!%p1373_p13)
}
 0x1ae   : > { %s1455_s11 = smov 128   ;;  %s1456_s22 = smov 8  }
 0x1af   : > { %1249 = dma.vmem_to_hbm [thread:$0]  (%p1552_p3), %s1026_s16, 256, %s1028_s30, %s1013_s2, %s1455_s11, %s1455_s11, %s1456_s22  }
 0x1b0 PF: > { %s1884_s26 = sld [smem:[#allocation14_spill]] }
 0x1b1   : > { %s1885_s20 = sld [smem:[#allocation10_spill]] }
 0x1b6   : > { %p1261_p0 = scmp.ge.s32.totalorder %s1884_s26, 2 }
 0x1b7   : > { %s1042_s25 = sand.u32 1, %s1885_s20  }
 0x1b8   : > { %p1256_p1 = pnand %p1261_p0, %p1562_p9  ;;  %s1043_s23 = scalar_lea.sflag [#allocation5], %s1042_s25 }
 0x1ba   : > { %p1257_p2 = pneg %p1256_p1 }
 0x1bc   : > { %1414 = dma.done.wait (%p1257_p2), %s1043_s23, 256  }
 0x1bd   : > { %1416 = vsyncadd (%p1257_p2), %s1043_s23, 4294967040  ;;  %s22_s12 = sadd.s32 1, %s1884_s26   ;;  %s1887_s19 = sld [smem:[#allocation11_spill]] }
 0x1be   : > { %p19_p4 = scmp.ge.s32.totalorder %s22_s12, 8   ;;  %s1888_s29 = sld [smem:[#allocation18_spill]] }
 0x1bf   : > { %s1889_s30 = sld [smem:[#allocation12_spill]]  ;;  %s1893_s27 = smov %s1423_s28 }
 0x1c0   : > { %s1890_s9 = sld [smem:[#allocation13_spill]]  ;;  %21 = sbr.rel (!%p19_p4) target bundleno = 10 (0xa), region = 118 }
 0x1c1   : > { %s1891_s10 = sld [smem:[#allocation15_spill]] }
 0x1c2   : > { %s1892_s11 = sld [smem:[#allocation16_spill]] }
 0x1c3   : > { %s1894_s28 = smov %s1887_s19 }
 0x1c5   :  { %1049 = vsyncpa [#allocation5], 1 }
 0x1c6   :  { %1051 = vsyncpa [#allocation5 + $0x1], 1 }
 0x1c7   :  { %1052 = vsyncpa [#allocation6], 1 }
 0x1c8   :  { %1054 = vsyncpa [#allocation6 + $0x1], 1 }

</bundles_post_ra>
